<compile_context>
chip_gen: v7x
topology: tpu7x:2x2x1
jax: 0.10.0
libtpu: 0.0.40
codegen_flags: <defaults>
</compile_context>

<pallas_src>
import functools

import numpy as np

import jax
import jax.numpy as jnp
from jax.experimental import pallas as pl
from jax.experimental.pallas import tpu as pltpu


_LANES = 128
_MIB = 1024 * 1024


def _round_up(x, m):
    return (x + m - 1) // m * m


def _tpu_vmem_bytes():
    """Physical VMEM of the local TPU generation (conservative fallback)."""
    try:
        return int(pltpu.get_tpu_info().vmem_capacity_bytes)
    except Exception:
        return 64 * _MIB  # v7x has the smallest VMEM (64 MiB)


def _choose_row_tile(n_rows, row_bytes, max_block_bytes, force_split):
    """Largest multiple-of-8 row tile with block <= max_block_bytes.

    The grid uses pl.cdiv, so the tile does NOT have to divide n_rows (the
    last block may overhang; Pallas masks the out-of-bounds stores).
    """
    max_rows = max(8, (max_block_bytes // max(row_bytes, 1)) // 8 * 8)
    tile = min(_round_up(n_rows, 8), max_rows)
    tile = max(8, tile // 8 * 8)
    if force_split and tile >= n_rows and n_rows > 8:
        # Dual-TensorCore chip and the whole input fits one block: split so the
        # "parallel" grid axis gives the second core work.
        tile = max(8, _round_up((n_rows + 1) // 2, 8))
    return tile


def _normalize(x, mn, mx, eps, out_dtype):
    """Exact (x - mn) / (mx - mn + eps) in f32 (review: approx recip dropped)."""
    x32 = x.astype(jnp.float32)
    mn32 = mn.astype(jnp.float32)
    mx32 = mx.astype(jnp.float32)
    return ((x32 - mn32) / (mx32 - mn32 + eps)).astype(out_dtype)


def _minmax_packed_kernel(x_ref, o_ref, *, seg, eps):
    """Lane-dense kernel: each 128-lane row holds 128 // seg segments of `seg`.

    XOR butterfly: at step s, lane i combines with partner lane (i ^ s), which
    is always inside the same seg-aligned segment.  With jnp.roll semantics
    (out[i] = in[(i - shift) mod n], which pltpu.roll follows -- verified by the
    previous kernel's runtime self-test), the partner arrives via roll(+s) when
    bit s of the lane id is set, and via roll(lanes - s) otherwise.
    """
    x = x_ref[...]
    lanes = x.shape[-1]
    mn = x
    mx = x
    if seg > 1:
        # (1, lanes) iota: the select mask only depends on the lane id, so it
        # broadcasts over rows for free (no rolled lane ids, review item).
        lane = jax.lax.broadcasted_iota(jnp.int32, (1, lanes), 1)

        # Step s=1: mn == mx == x, so one rolled partner serves both (2 rolls).
        take_fwd = (lane & 1) != 0
        p = jnp.where(take_fwd,
                      pltpu.roll(x, 1, axis=1),
                      pltpu.roll(x, lanes - 1, axis=1))
        mn = jnp.minimum(x, p)
        mx = jnp.maximum(x, p)

        s = 2
        while s < seg:
            take_fwd = (lane & s) != 0
            pmn = jnp.where(take_fwd,
                            pltpu.roll(mn, s, axis=1),
                            pltpu.roll(mn, lanes - s, axis=1))
            mn = jnp.minimum(mn, pmn)
            pmx = jnp.where(take_fwd,
                            pltpu.roll(mx, s, axis=1),
                            pltpu.roll(mx, lanes - s, axis=1))
            mx = jnp.maximum(mx, pmx)
            s *= 2

    o_ref[...] = _normalize(x, mn, mx, eps, o_ref.dtype)


def _minmax_rows_kernel(x_ref, o_ref, *, eps):
    """Fallback: one row per normalization group (full-lane XLU reduction)."""
    x = x_ref[...]
    mn = jnp.min(x, axis=-1, keepdims=True)
    mx = jnp.max(x, axis=-1, keepdims=True)
    o_ref[...] = _normalize(x, mn, mx, eps, o_ref.dtype)


def minmax_norm(x, eps=1e-6):
    """Min-max normalize along the last axis, matching the PyTorch module."""
    orig_shape = x.shape
    dtype = x.dtype
    w = orig_shape[-1]
    rows = 1
    for s in orig_shape[:-1]:
        rows *= s
    if rows == 0 or w == 0:
        return x

    x2d = x.reshape(rows, w)
    itemsize = jnp.dtype(dtype).itemsize
    vmem_bytes = _tpu_vmem_bytes()
    # v7x heuristic: 64 MiB VMEM per TC and 2 TensorCores per chip.
    dual_core = vmem_bytes < 100 * _MIB

    # --- Lane padding for awkward small W (review: avoid masked vst) --------
    # Pad W up to the next power of two (a divisor of 128) with replicas of
    # column 0 so per-row min/max are unchanged; slice the padding off at the
    # end.  Only this rare fallback pays the extra pad/slice passes.
    w_work = w
    lane_padded = False
    if w < _LANES and _LANES % w != 0:
        w_work = 1 << (w - 1).bit_length()   # next power of two (<= 128)
        pad_cols = jnp.broadcast_to(x2d[:, :1], (rows, w_work - w))
        x2d = jnp.concatenate([x2d, pad_cols], axis=1)
        lane_padded = True

    lane_packed = (w_work < _LANES) and (_LANES % w_work == 0)

    # --- Build the 2-D kernel view ------------------------------------------
    row_padded = 0
    if lane_packed:
        group = _LANES // w_work           # W-segments packed per 128-lane row
        if rows % group != 0:
            # Rare: a few zero rows so the row-major re-view to 128 lanes is
            # valid.  Zero segments stay inside their own segment (butterfly
            # never crosses segment boundaries), so valid rows are unaffected.
            row_padded = group - rows % group
            x2d = jnp.pad(x2d, ((0, row_padded), (0, 0)))
        packed_rows = (rows + row_padded) // group
        x_kernel = x2d.reshape(packed_rows, _LANES)   # pure row-major re-view
        lanes = _LANES
        kernel = functools.partial(_minmax_packed_kernel, seg=w_work, eps=eps)
    else:
        packed_rows = rows
        x_kernel = x2d
        lanes = w_work
        kernel = functools.partial(_minmax_rows_kernel, eps=eps)

    # --- Tiling / VMEM budget ------------------------------------------------
    if vmem_bytes >= 100 * _MIB:           # v5e / v6e: 128 MiB physical VMEM
        max_block_bytes = 4 * _MIB
    else:                                  # v7x / unknown: 64 MiB physical
        max_block_bytes = 2 * _MIB
    row_bytes = lanes * itemsize
    total_bytes = packed_rows * row_bytes
    force_split = dual_core and total_bytes > _MIB
    row_tile = _choose_row_tile(packed_rows, row_bytes, max_block_bytes,
                                force_split)
    block_bytes = row_tile * row_bytes
    # Double-buffered in+out windows plus ~7 block-sized in-kernel temporaries.
    vmem_limit = int(min(vmem_bytes // 2, max(32 * _MIB, 12 * block_bytes)))

    grid = (pl.cdiv(packed_rows, row_tile),)

    out = pl.pallas_call(
        kernel,
        out_shape=jax.ShapeDtypeStruct((packed_rows, lanes), dtype),
        grid_spec=pltpu.PrefetchScalarGridSpec(
            num_scalar_prefetch=0,
            grid=grid,
            in_specs=[pl.BlockSpec((row_tile, lanes), lambda i: (i, 0))],
            out_specs=pl.BlockSpec((row_tile, lanes), lambda i: (i, 0)),
        ),
        compiler_params=pltpu.CompilerParams(
            dimension_semantics=("parallel",),
            vmem_limit_bytes=vmem_limit,
        ),
    )(x_kernel)

    # --- Undo packing / padding (main path: reshapes only, no copies) --------
    if lane_packed:
        out2d = out.reshape(rows + row_padded, w_work)
        if row_padded:
            out2d = out2d[:rows]
    else:
        out2d = out
    if lane_padded:
        out2d = out2d[:, :w]
    return out2d.reshape(orig_shape)


def _reference(x, eps=1e-6):
    mn = jnp.min(x, axis=-1, keepdims=True)
    mx = jnp.max(x, axis=-1, keepdims=True)
    return (x - mn) / (mx - mn + eps)


if __name__ == "__main__":
    key = jax.random.PRNGKey(0)

    # Main NCHW shape consistent with the module: B=2, C=4, H=16, W=16
    # (W=16 exercises the lane-dense packed butterfly path, zero host pads).
    x = jax.random.normal(key, (2, 4, 16, 16), dtype=jnp.float32)
    out = jax.block_until_ready(minmax_norm(x, eps=1e-6))
    ref = _reference(x, eps=1e-6)
    assert out.shape == x.shape
    err = float(jnp.max(jnp.abs(out - ref)))
    assert err < 1e-5, f"packed path max abs error {err}"

    # W=96 (does not divide 128): lane-padded to 128, full-row reduction,
    # partial last grid block (15 rows, 16-row tile).
    x2 = jax.random.normal(jax.random.fold_in(key, 1), (3, 5, 96),
                           dtype=jnp.float32)
    out2 = jax.block_until_ready(minmax_norm(x2, eps=1e-6))
    ref2 = _reference(x2, eps=1e-6)
    assert out2.shape == x2.shape
    err2 = float(jnp.max(jnp.abs(out2 - ref2)))
    assert err2 < 1e-5, f"fallback path max abs error {err2}"

    # W=10: lane-padded to 16 then packed; also exercises row padding (6 rows
    # padded to 8) and a block (8,128) larger than the (1,128) kernel array.
    x3 = jax.random.normal(jax.random.fold_in(key, 2), (2, 3, 10),
                           dtype=jnp.float32)
    out3 = jax.block_until_ready(minmax_norm(x3, eps=1e-6))
    ref3 = _reference(x3, eps=1e-6)
    assert out3.shape == x3.shape
    err3 = float(jnp.max(jnp.abs(out3 - ref3)))
    assert err3 < 1e-5, f"padded packed path max abs error {err3}"

    print("KERNEL_OK")
</pallas_src>

<mosaic_0001>
module attributes {stable_mosaic.version = 11 : i64} {
  func.func @_minmax_packed_kernel(%arg0: i32, %arg1: memref<16x128xf32, #tpu.memory_space<vmem>>, %arg2: memref<16x128xf32, #tpu.memory_space<vmem>>) attributes {dimension_semantics = [#tpu.dimension_semantics<parallel>], iteration_bounds = array<i64: 1>, scalar_prefetch = 0 : i64, scratch_operands = 0 : i64, tpu.core_type = #tpu.core_type<tc>, window_params = [{transform_indices = @transform_0, window_bounds = array<i64: 16, 128>}, {transform_indices = @transform_1, window_bounds = array<i64: 16, 128>}]} {
    %c0 = arith.constant 0 : index
    %c0_0 = arith.constant 0 : index
    %0 = vector.load %arg1[%c0, %c0_0] : memref<16x128xf32, #tpu.memory_space<vmem>>, vector<16x128xf32>
    %1 = tpu.iota {dimensions = array<i32: 1>} : vector<1x128xi32>
    %c1_i32 = arith.constant 1 : i32
    %2 = vector.broadcast %c1_i32 : i32 to vector<1x128xi32>
    %3 = arith.andi %1, %2 : vector<1x128xi32>
    %c0_i32 = arith.constant 0 : i32
    %4 = vector.broadcast %c0_i32 : i32 to vector<1x128xi32>
    %5 = arith.cmpi ne, %3, %4 : vector<1x128xi32>
    %c1_i32_1 = arith.constant 1 : i32
    %6 = tpu.dynamic_rotate %0 by %c1_i32_1 dim 1 : vector<16x128xf32>, i32 -> vector<16x128xf32>
    %c127_i32 = arith.constant 127 : i32
    %7 = tpu.dynamic_rotate %0 by %c127_i32 dim 1 : vector<16x128xf32>, i32 -> vector<16x128xf32>
    %8 = vector.shape_cast %5 : vector<1x128xi1> to vector<1x128xi1>
    %9 = vector.broadcast %8 : vector<1x128xi1> to vector<16x128xi1>
    %10 = arith.select %9, %6, %7 : vector<16x128xi1>, vector<16x128xf32>
    %11 = arith.minimumf %0, %10 : vector<16x128xf32>
    %12 = arith.maximumf %0, %10 : vector<16x128xf32>
    %c2_i32 = arith.constant 2 : i32
    %13 = vector.broadcast %c2_i32 : i32 to vector<1x128xi32>
    %14 = arith.andi %1, %13 : vector<1x128xi32>
    %c0_i32_2 = arith.constant 0 : i32
    %15 = vector.broadcast %c0_i32_2 : i32 to vector<1x128xi32>
    %16 = arith.cmpi ne, %14, %15 : vector<1x128xi32>
    %c2_i32_3 = arith.constant 2 : i32
    %17 = tpu.dynamic_rotate %11 by %c2_i32_3 dim 1 : vector<16x128xf32>, i32 -> vector<16x128xf32>
    %c126_i32 = arith.constant 126 : i32
    %18 = tpu.dynamic_rotate %11 by %c126_i32 dim 1 : vector<16x128xf32>, i32 -> vector<16x128xf32>
    %19 = vector.shape_cast %16 : vector<1x128xi1> to vector<1x128xi1>
    %20 = vector.broadcast %19 : vector<1x128xi1> to vector<16x128xi1>
    %21 = arith.select %20, %17, %18 : vector<16x128xi1>, vector<16x128xf32>
    %22 = arith.minimumf %11, %21 : vector<16x128xf32>
    %c2_i32_4 = arith.constant 2 : i32
    %23 = tpu.dynamic_rotate %12 by %c2_i32_4 dim 1 : vector<16x128xf32>, i32 -> vector<16x128xf32>
    %c126_i32_5 = arith.constant 126 : i32
    %24 = tpu.dynamic_rotate %12 by %c126_i32_5 dim 1 : vector<16x128xf32>, i32 -> vector<16x128xf32>
    %25 = vector.shape_cast %16 : vector<1x128xi1> to vector<1x128xi1>
    %26 = vector.broadcast %25 : vector<1x128xi1> to vector<16x128xi1>
    %27 = arith.select %26, %23, %24 : vector<16x128xi1>, vector<16x128xf32>
    %28 = arith.maximumf %12, %27 : vector<16x128xf32>
    %c4_i32 = arith.constant 4 : i32
    %29 = vector.broadcast %c4_i32 : i32 to vector<1x128xi32>
    %30 = arith.andi %1, %29 : vector<1x128xi32>
    %c0_i32_6 = arith.constant 0 : i32
    %31 = vector.broadcast %c0_i32_6 : i32 to vector<1x128xi32>
    %32 = arith.cmpi ne, %30, %31 : vector<1x128xi32>
    %c4_i32_7 = arith.constant 4 : i32
    %33 = tpu.dynamic_rotate %22 by %c4_i32_7 dim 1 : vector<16x128xf32>, i32 -> vector<16x128xf32>
    %c124_i32 = arith.constant 124 : i32
    %34 = tpu.dynamic_rotate %22 by %c124_i32 dim 1 : vector<16x128xf32>, i32 -> vector<16x128xf32>
    %35 = vector.shape_cast %32 : vector<1x128xi1> to vector<1x128xi1>
    %36 = vector.broadcast %35 : vector<1x128xi1> to vector<16x128xi1>
    %37 = arith.select %36, %33, %34 : vector<16x128xi1>, vector<16x128xf32>
    %38 = arith.minimumf %22, %37 : vector<16x128xf32>
    %c4_i32_8 = arith.constant 4 : i32
    %39 = tpu.dynamic_rotate %28 by %c4_i32_8 dim 1 : vector<16x128xf32>, i32 -> vector<16x128xf32>
    %c124_i32_9 = arith.constant 124 : i32
    %40 = tpu.dynamic_rotate %28 by %c124_i32_9 dim 1 : vector<16x128xf32>, i32 -> vector<16x128xf32>
    %41 = vector.shape_cast %32 : vector<1x128xi1> to vector<1x128xi1>
    %42 = vector.broadcast %41 : vector<1x128xi1> to vector<16x128xi1>
    %43 = arith.select %42, %39, %40 : vector<16x128xi1>, vector<16x128xf32>
    %44 = arith.maximumf %28, %43 : vector<16x128xf32>
    %c8_i32 = arith.constant 8 : i32
    %45 = vector.broadcast %c8_i32 : i32 to vector<1x128xi32>
    %46 = arith.andi %1, %45 : vector<1x128xi32>
    %c0_i32_10 = arith.constant 0 : i32
    %47 = vector.broadcast %c0_i32_10 : i32 to vector<1x128xi32>
    %48 = arith.cmpi ne, %46, %47 : vector<1x128xi32>
    %c8_i32_11 = arith.constant 8 : i32
    %49 = tpu.dynamic_rotate %38 by %c8_i32_11 dim 1 : vector<16x128xf32>, i32 -> vector<16x128xf32>
    %c120_i32 = arith.constant 120 : i32
    %50 = tpu.dynamic_rotate %38 by %c120_i32 dim 1 : vector<16x128xf32>, i32 -> vector<16x128xf32>
    %51 = vector.shape_cast %48 : vector<1x128xi1> to vector<1x128xi1>
    %52 = vector.broadcast %51 : vector<1x128xi1> to vector<16x128xi1>
    %53 = arith.select %52, %49, %50 : vector<16x128xi1>, vector<16x128xf32>
    %54 = arith.minimumf %38, %53 : vector<16x128xf32>
    %c8_i32_12 = arith.constant 8 : i32
    %55 = tpu.dynamic_rotate %44 by %c8_i32_12 dim 1 : vector<16x128xf32>, i32 -> vector<16x128xf32>
    %c120_i32_13 = arith.constant 120 : i32
    %56 = tpu.dynamic_rotate %44 by %c120_i32_13 dim 1 : vector<16x128xf32>, i32 -> vector<16x128xf32>
    %57 = vector.shape_cast %48 : vector<1x128xi1> to vector<1x128xi1>
    %58 = vector.broadcast %57 : vector<1x128xi1> to vector<16x128xi1>
    %59 = arith.select %58, %55, %56 : vector<16x128xi1>, vector<16x128xf32>
    %60 = arith.maximumf %44, %59 : vector<16x128xf32>
    %61 = arith.subf %0, %54 : vector<16x128xf32>
    %62 = arith.subf %60, %54 : vector<16x128xf32>
    %cst = arith.constant 9.99999997E-7 : f32
    %63 = vector.broadcast %cst : f32 to vector<16x128xf32>
    %64 = arith.addf %62, %63 : vector<16x128xf32>
    %65 = arith.divf %61, %64 : vector<16x128xf32>
    %c0_14 = arith.constant 0 : index
    %c0_15 = arith.constant 0 : index
    %66 = vector.load %arg2[%c0_14, %c0_15] : memref<16x128xf32, #tpu.memory_space<vmem>>, vector<16x128xf32>
    tpu.vector_store %arg2[%c0_14, %c0_15], %65 {strides = array<i32>} : memref<16x128xf32, #tpu.memory_space<vmem>>, vector<16x128xf32>,
    return
  }
  func.func @transform_0(%arg0: i32) -> (i32, i32) {
    %c0_i32 = arith.constant 0 : i32
    %c0_i32_0 = arith.constant 0 : i32
    return %arg0, %c0_i32 : i32, i32
  }
  func.func @transform_1(%arg0: i32) -> (i32, i32) {
    %c0_i32 = arith.constant 0 : i32
    %c0_i32_0 = arith.constant 0 : i32
    return %arg0, %c0_i32 : i32, i32
  }
}

</mosaic_0001>

<bundles_post_ra>
// kernel: tpu_custom_call.1
= control target key start
LH: loop header
LB: loop body
LE: loop exit
PB: predicated region body
PF: predicated region fallthrough
CT: control target
= control target key end

     0   :  { %6 = vsyncpa [#allocation3], 0  ;;  %s320_s0 = inlined_call_operand.hbm [shape: f32[16,128], index: 0, kind: input, shape index: {}]   ;;  %s321_s1 = inlined_call_operand.hbm [shape: f32[16,128], index: 1, kind: output, shape index: {}]  }
   0x1   :  { %7 = vsyncpa [#allocation4], 0  ;;  %s221_s6 = smov [#allocation2]   ;;  %s173_s10 = scalar_lea.hbm %s320_s0, 256 }
   0x2   :  { %s13_s7 = sshll.u32 %s221_s6, 4  ;;  %p174_p0 = scmp.ne.s32.totalorder %s320_s0, %s173_s10  ;;  %s14_s7 = int_to_ptr.vmem [resolvable:$true] %s13_s7 }
   0x3   :  { %p177_p1 = scmp.lt.u32.totalorder %s173_s10, %s320_s0 }
   0x5   :  { %p179_p2 = pnand %p177_p1, %p174_p0 }
   0x7   :  { %182 = shalt.err (!%p179_p2)
}
   0x8   :  { %s183_s15 = scalar_lea.vmem %s14_s7, 256  ;;  %p188_p4 = scmp.lt.s32.totalorder %s14_s7, %s14_s7 }
   0x9   :  { %p184_p3 = scmp.ne.s32.totalorder %s14_s7, %s183_s15  ;;  %p189_p5 = scmp.lt.s32.totalorder %s183_s15, %s183_s15 }
   0xb   :  { %p190_p6 = por %p189_p5, %p188_p4 }
   0xd   :  { %p191_p7 = pnand %p190_p6, %p184_p3 }
   0xf   :  { %194 = shalt.err (!%p191_p7)
}
  0x10   :  { %s222_s16 = smov 128   ;;  %s223_s17 = smov 8  }
  0x11   :  { %19 = dma.hbm_to_vmem [thread:$0]  %s320_s0, 256, %s14_s7, [#allocation3], %s222_s16, %s222_s16, %s223_s17  }
  0x12   :  { %217 = dma.done.wait [#allocation3], 256  }
  0x13   :  { %218 = vsyncadd [#allocation3], 4294967040  ;;  %v257_v0 = vld [vmem:[#allocation2] sm:$0xff]  ;;  %s224_s20 = smov 127   ;;  %s225_s21 = smov 1   ;;  %v261_v1 = vld [vmem:[#allocation2 + $0x8] sm:$0xff]  ;;  %v25_v2 = vlaneseq }
  0x14   :  { %33 = vrot.lane.b32.xlu1 %v257_v0, %s224_s20  ;;  %29 = vrot.lane.b32.xlu0 %v257_v0, %s225_s21  ;;  %s226_s0 = smov 2   ;;  %s227_s22 = smov 126  }
  0x15   :  { %v265_v3 = vand.u32 127, %v25_v2  ;;  %s228_s23 = smov 4   ;;  %s229_s24 = smov 124  }
  0x16   :  { %s230_s25 = smov 120   ;;  %s231_s26 = smov [#allocation5]  }
  0x17   :  { %v27_v4 = vand.u32 1, %v265_v3  ;;  %v45_v15 = vand.u32 2, %v265_v3  ;;  %v73_v33 = vand.u32 4, %v265_v3  ;;  %v101_v53 = vand.u32 8, %v265_v3  ;;  %s146_s27 = sshll.u32 %s231_s26, 4  ;;  %s147_s27 = int_to_ptr.vmem [resolvable:$true] %s146_s27 }
  0x18   :  { %35 = vrot.lane.b32.xlu1 %v261_v1, %s224_s20  ;;  %31 = vrot.lane.b32.xlu0 %v261_v1, %s225_s21  ;;  %s195_s28 = scalar_lea.vmem %s147_s27, 256  ;;  %p200_p9 = scmp.lt.s32.totalorder %s147_s27, %s147_s27 }
  0x19   :  { %vm28_vm0 = vcmp.ne.s32.totalorder %v27_v4, 0  ;;  %vm273_vm1 = vcmp.ne.s32.totalorder %v45_v15, 0  ;;  %vm286_vm2 = vcmp.ne.s32.totalorder %v73_v33, 0  ;;  %vm102_vm3 = vcmp.ne.s32.totalorder %v101_v53, 0  ;;  %p196_p8 = scmp.ne.s32.totalorder %s147_s27, %s195_s28  ;;  %p201_p10 = scmp.lt.s32.totalorder %s195_s28, %s195_s28 }
  0x1b   :  { %p202_p11 = por %p201_p10, %p200_p9 }
  0x1d   :  { %p203_p12 = pnand %p202_p11, %p196_p8 }
  0x86   :  { %v34_v5 = vpop.permute.xlu1 %33  ;;  %v30_v6 = vpop.permute.xlu0 %29 }
  0x87   :  { %v39_v7 = vsel %vm28_vm0, %v30_v6, %v34_v5 }
  0x88   :  { %v41_v8 = vmin.f32 %v257_v0, %v39_v7  ;;  %v43_v13 = vmax.f32 %v257_v0, %v39_v7 }
  0x8a   :  { %v36_v9 = vpop.permute.xlu1 %35  ;;  %47 = vrot.lane.b32.xlu0 %v41_v8, %s226_s0  ;;  %v32_v10 = vpop.permute.xlu0 %31 }
  0x8b   :  { %v40_v11 = vsel %vm28_vm0, %v32_v10, %v36_v9 }
  0x8c   :  { %v42_v12 = vmin.f32 %v261_v1, %v40_v11  ;;  %v44_v14 = vmax.f32 %v261_v1, %v40_v11 }
  0x8e   :  { %51 = vrot.lane.b32.xlu0 %v41_v8, %s227_s22  ;;  %49 = vrot.lane.b32.xlu1 %v42_v12, %s226_s0 }
  0x92   :  { %61 = vrot.lane.b32.xlu0 %v43_v13, %s226_s0  ;;  %53 = vrot.lane.b32.xlu1 %v42_v12, %s227_s22 }
  0x96   :  { %65 = vrot.lane.b32.xlu0 %v43_v13, %s227_s22  ;;  %63 = vrot.lane.b32.xlu1 %v44_v14, %s226_s0 }
  0x9a   :  { %67 = vrot.lane.b32.xlu1 %v44_v14, %s227_s22 }
  0xfc   :  { %v48_v16 = vpop.permute.xlu0 %47 }
 0x100   :  { %v50_v18 = vpop.permute.xlu1 %49  ;;  %v52_v19 = vpop.permute.xlu0 %51 }
 0x101   :  { %v57_v20 = vsel %vm273_vm1, %v48_v16, %v52_v19 }
 0x102   :  { %v59_v21 = vmin.f32 %v41_v8, %v57_v20 }
 0x104   :  { %v54_v22 = vpop.permute.xlu1 %53  ;;  %75 = vrot.lane.b32.xlu0 %v59_v21, %s228_s23  ;;  %v62_v23 = vpop.permute.xlu0 %61 }
 0x105   :  { %v58_v24 = vsel %vm273_vm1, %v50_v18, %v54_v22 }
 0x106   :  { %v60_v25 = vmin.f32 %v42_v12, %v58_v24 }
 0x108   :  { %77 = vrot.lane.b32.xlu1 %v60_v25, %s228_s23  ;;  %v64_v26 = vpop.permute.xlu1 %63  ;;  %79 = vrot.lane.b32.xlu0 %v59_v21, %s229_s24  ;;  %v66_v27 = vpop.permute.xlu0 %65 }
 0x109   :  { %v69_v28 = vsel %vm273_vm1, %v62_v23, %v66_v27 }
 0x10a   :  { %v71_v29 = vmax.f32 %v43_v13, %v69_v28 }
 0x10c   :  { %81 = vrot.lane.b32.xlu1 %v60_v25, %s229_s24  ;;  %v68_v30 = vpop.permute.xlu1 %67  ;;  %89 = vrot.lane.b32.xlu0 %v71_v29, %s228_s23 }
 0x10d   :  { %v70_v31 = vsel %vm273_vm1, %v64_v26, %v68_v30 }
 0x10e   :  { %v72_v32 = vmax.f32 %v44_v14, %v70_v31 }
 0x110   :  { %91 = vrot.lane.b32.xlu1 %v72_v32, %s228_s23  ;;  %93 = vrot.lane.b32.xlu0 %v71_v29, %s229_s24 }
 0x114   :  { %95 = vrot.lane.b32.xlu1 %v72_v32, %s229_s24 }
 0x176   :  { %v76_v34 = vpop.permute.xlu0 %75 }
 0x17a   :  { %v78_v36 = vpop.permute.xlu1 %77  ;;  %v80_v37 = vpop.permute.xlu0 %79 }
 0x17b   :  { %v85_v38 = vsel %vm286_vm2, %v76_v34, %v80_v37 }
 0x17c   :  { %v87_v39 = vmin.f32 %v59_v21, %v85_v38 }
 0x17e   :  { %v82_v40 = vpop.permute.xlu1 %81  ;;  %103 = vrot.lane.b32.xlu0 %v87_v39, %s223_s17  ;;  %v90_v41 = vpop.permute.xlu0 %89 }
 0x17f   :  { %v86_v42 = vsel %vm286_vm2, %v78_v36, %v82_v40 }
 0x180   :  { %v88_v43 = vmin.f32 %v60_v25, %v86_v42 }
 0x182   :  { %105 = vrot.lane.b32.xlu1 %v88_v43, %s223_s17  ;;  %v92_v44 = vpop.permute.xlu1 %91  ;;  %107 = vrot.lane.b32.xlu0 %v87_v39, %s230_s25  ;;  %v94_v45 = vpop.permute.xlu0 %93 }
 0x183   :  { %v97_v46 = vsel %vm286_vm2, %v90_v41, %v94_v45 }
 0x184   :  { %v99_v47 = vmax.f32 %v71_v29, %v97_v46 }
 0x186   :  { %109 = vrot.lane.b32.xlu1 %v88_v43, %s230_s25  ;;  %v96_v48 = vpop.permute.xlu1 %95  ;;  %117 = vrot.lane.b32.xlu0 %v99_v47, %s223_s17 }
 0x187   :  { %v98_v49 = vsel %vm286_vm2, %v92_v44, %v96_v48 }
 0x188   :  { %v100_v50 = vmax.f32 %v72_v32, %v98_v49 }
 0x18a   :  { %119 = vrot.lane.b32.xlu1 %v100_v50, %s223_s17  ;;  %121 = vrot.lane.b32.xlu0 %v99_v47, %s230_s25 }
 0x18e   :  { %123 = vrot.lane.b32.xlu1 %v100_v50, %s230_s25 }
 0x1f0   :  { %v104_v51 = vpop.permute.xlu0 %103 }
 0x1f4   :  { %v106_v52 = vpop.permute.xlu1 %105  ;;  %v108_v54 = vpop.permute.xlu0 %107 }
 0x1f5   :  { %v113_v57 = vsel %vm102_vm3, %v104_v51, %v108_v54 }
 0x1f6   :  { %v115_v61 = vmin.f32 %v87_v39, %v113_v57 }
 0x1f8   :  { %v110_v55 = vpop.permute.xlu1 %109  ;;  %v118_v56 = vpop.permute.xlu0 %117  ;;  %v129_v10 = vsub.f32 %v257_v0, %v115_v61 }
 0x1f9   :  { %v114_v63 = vsel %vm102_vm3, %v106_v52, %v110_v55 }
 0x1fa   :  { %v116_v6 = vmin.f32 %v88_v43, %v114_v63 }
 0x1fc   :  { %v120_v58 = vpop.permute.xlu1 %119  ;;  %v122_v59 = vpop.permute.xlu0 %121  ;;  %v130_v13 = vsub.f32 %v261_v1, %v116_v6 }
 0x1fd   :  { %v125_v60 = vsel %vm102_vm3, %v118_v56, %v122_v59 }
 0x1fe   :  { %v127_v62 = vmax.f32 %v99_v47, %v125_v60 }
 0x200   :  { %v131_v2 = vsub.f32 %v127_v62, %v115_v61  ;;  %v124_v4 = vpop.permute.xlu1 %123 }
 0x201   :  { %v126_v5 = vsel %vm102_vm3, %v120_v58, %v124_v4 }
 0x202   :  { %v133_v7 = vadd.f32 1e-06, %v131_v2  ;;  %v128_v8 = vmax.f32 %v100_v50, %v126_v5 }
 0x204   :  { %169 = vrcp.f32 %v133_v7  ;;  %v132_v9 = vsub.f32 %v128_v8, %v116_v6 }
 0x206   :  { %v134_v3 = vadd.f32 1e-06, %v132_v9 }
 0x208   :  { %171 = vrcp.f32 %v134_v3 }
 0x20e   :  { %v170_v11 = vpop.eup %169 }
 0x20f   :  { %v136_v12 = vmul.f32 %v170_v11, %v129_v10 }
 0x211   :  { %139 = vst [vmem:[#allocation5] sm:$0xff] %v136_v12 }
 0x212   :  { %v172_v14 = vpop.eup %171 }
 0x213   :  { %v138_v15 = vmul.f32 %v172_v14, %v130_v13 }
 0x215   :  { %140 = vst [vmem:[#allocation5 + $0x8] sm:$0xff] %v138_v15 }
 0x216   :  { %206 = shalt.err (!%p203_p12)
}
 0x217   :  { %s207_s2 = scalar_lea.hbm %s321_s1, 256 }
 0x218   :  { %p208_p13 = scmp.ne.s32.totalorder %s321_s1, %s207_s2  ;;  %p211_p0 = scmp.lt.u32.totalorder %s207_s2, %s321_s1 }
 0x21a   :  { %p213_p1 = pnand %p211_p0, %p208_p13 }
 0x21c   :  { %216 = shalt.err (!%p213_p1)
}
 0x21d   :  { %152 = dma.vmem_to_hbm [thread:$0]  %s147_s27, 256, %s321_s1, [#allocation4], %s222_s16, %s222_s16, %s223_s17  }
 0x21e   :  { %219 = dma.done.wait [#allocation4], 256  }
 0x21f   :  { %220 = vsyncadd [#allocation4], 4294967040 }
 0x220   :  { %156 = vsyncpa [#allocation3], 1 }
 0x221   :  { %157 = vsyncpa [#allocation4], 1 }

</bundles_post_ra>
